<compile_context>
chip_gen: v6e
topology: v6e:2x2x1
jax: 0.10.0
libtpu: 0.0.40
codegen_flags: <defaults>
</compile_context>

<pallas_src>
import functools

import jax
import jax.numpy as jnp
import numpy as np
from jax.experimental import pallas as pl
from jax.experimental.pallas import tpu as pltpu


def _bn_relu_conv_kernel(x_ref, sb_ref, w_ref, o_ref, *, matmul_dtype):
    # x_ref : (Nb, Cin, TS)   channels on sublanes, spatial on lanes
    # sb_ref: (Cin, 2)        col 0 = folded BN scale, col 1 = folded BN bias
    # w_ref : (Cout, Cin)     pointwise conv weight
    # o_ref : (Nb, Cout, TS)  lane-dense output tile
    scale = sb_ref[:, 0:1]                     # (Cin, 1), f32
    bias = sb_ref[:, 1:2]                      # (Cin, 1), f32
    w = w_ref[...].astype(matmul_dtype)        # (Cout, Cin)
    for nb in range(x_ref.shape[0]):           # Nb: small static int
        h = jnp.maximum(x_ref[nb] * scale + bias, 0.0).astype(matmul_dtype)
        o_ref[nb] = jnp.dot(w, h, preferred_element_type=jnp.float32
                            ).astype(o_ref.dtype)


def _vmem_limit_bytes():
    """Generation-aware VMEM request: ~7/8 of physical, capped at 112 MiB."""
    try:
        cap = pltpu.get_tpu_info().vmem_capacity_bytes
    except Exception:                          # pragma: no cover
        cap = 64 * 1024 * 1024                 # conservative (v7x-sized) fallback
    # v5e/v6e: 128 MiB -> 112 MiB ; v7x: 64 MiB -> 56 MiB (never the full 64).
    return min((cap * 7) // 8, 112 * 1024 * 1024)


def bn_ac_conv3d(x, gamma, beta, running_mean, running_var, weight, eps=1e-5,
                 spatial_tile=None, use_bf16_matmul=None, out_dtype=None):
    """Fused BN(eval) + ReLU + 1x1x1 Conv3d.

    x:      (N, C_in, D, H, W)   float32
    weight: (C_out, C_in, 1, 1, 1)
    returns (N, C_out, D, H, W) in `out_dtype` (default: x.dtype)
    """
    N, C, D, H, W = x.shape
    Cout = weight.shape[0]
    assert weight.shape == (Cout, C, 1, 1, 1), (
        "only the module-default 1x1x1, pad=0, stride=1, groups=1 conv is fused")

    if use_bf16_matmul is None:
        # bf16 MXU path pays off once the contraction is large; on v5e the f32
        # matmul is emulated, so large-channel cases should always take this.
        use_bf16_matmul = (C >= 128 and Cout >= 128)
    matmul_dtype = jnp.bfloat16 if use_bf16_matmul else jnp.float32
    out_dtype = x.dtype if out_dtype is None else out_dtype

    # Fold BN (inference mode) into one per-channel affine, kept in f32.
    scale = (gamma / jnp.sqrt(running_var + eps)).astype(jnp.float32)
    bias = (beta - running_mean * scale).astype(jnp.float32)
    sb = jnp.stack([scale, bias], axis=1)          # (Cin, 2) -> single DMA

    w2d = weight.reshape(Cout, C).astype(matmul_dtype)   # (Cout, Cin)

    # NCDHW kept as-is: flatten spatial onto the lane axis (pure view).
    S = D * H * W
    x3 = x.reshape(N, C, S)

    x_isz = jnp.dtype(x.dtype).itemsize
    o_isz = jnp.dtype(out_dtype).itemsize
    w_isz = jnp.dtype(matmul_dtype).itemsize
    mm_isz = w_isz

    vmem_limit = _vmem_limit_bytes()
    budget = vmem_limit - 2 * 1024 * 1024              # compiler-scratch headroom
    fixed = C * 2 * 4 + Cout * C * w_isz               # single-buffered sb + w
    # Per spatial lane per batch sample in the block:
    #   double-buffered x tile + double-buffered out tile + the materialized
    #   relu/cast intermediate h staged before the dot.
    per_lane = 2 * C * x_isz + 2 * Cout * o_isz + C * mm_isz

    S_round = pl.cdiv(S, 128) * 128
    ts = (budget - fixed) // per_lane if spatial_tile is None else spatial_tile
    TS = max(128, (min(ts, 8192, S_round) // 128) * 128)
    # Keep at least 2 grid steps so both v7x TensorCores get work.
    if N * pl.cdiv(S, TS) < 2 and TS > 128:
        TS = max(128, pl.cdiv(pl.cdiv(S, 2), 128) * 128)
    n_s = pl.cdiv(S, TS)

    # Block several batch samples per grid step when a (1, C, TS) tile is tiny,
    # to amortize the ~0.35us per-step pipeline overhead; keep >= 2 steps.
    Nb = 1
    for cand in range(N, 1, -1):
        if N % cand:
            continue
        if cand * per_lane * TS + fixed <= budget and (N // cand) * n_s >= 2:
            Nb = cand
            break
    grid = (N // Nb, n_s)

    cost = pl.CostEstimate(
        flops=2 * N * S * C * Cout,
        transcendentals=0,
        bytes_accessed=(N * S * C * x_isz + C * 2 * 4 + Cout * C * w_isz
                        + N * S * Cout * o_isz),
    )

    kernel = functools.partial(_bn_relu_conv_kernel, matmul_dtype=matmul_dtype)

    out3 = pl.pallas_call(
        kernel,
        out_shape=jax.ShapeDtypeStruct((N, Cout, S), out_dtype),
        grid=grid,
        in_specs=[
            pl.BlockSpec((Nb, C, TS), lambda n, j: (n, 0, j)),
            # Grid-invariant operands: single-buffer (double-buffering a
            # constant block only doubles its VMEM footprint).
            pl.BlockSpec((C, 2), lambda n, j: (0, 0),
                         pipeline_mode=pl.Buffered(1)),
            pl.BlockSpec((Cout, C), lambda n, j: (0, 0),
                         pipeline_mode=pl.Buffered(1)),
        ],
        out_specs=pl.BlockSpec((Nb, Cout, TS), lambda n, j: (n, 0, j)),
        compiler_params=pltpu.CompilerParams(
            dimension_semantics=("parallel", "parallel"),
            vmem_limit_bytes=vmem_limit,
        ),
        cost_estimate=cost,
    )(x3, sb, w2d)

    return out3.reshape(N, Cout, D, H, W)


def _reference(x, gamma, beta, running_mean, running_var, weight, eps=1e-5):
    # Plain-JAX reference of BN(eval)+ReLU+1x1x1 conv for verification.
    scale = gamma / jnp.sqrt(running_var + eps)
    bias = beta - running_mean * scale
    h = jnp.maximum(x * scale[None, :, None, None, None]
                    + bias[None, :, None, None, None], 0.0)
    w2d = weight.reshape(weight.shape[0], weight.shape[1])  # (Cout, Cin)
    return jnp.einsum('ncdhw,oc->nodhw', h, w2d)


def _make_inputs(key, N, Cin, D, H, W, Cout):
    k = jax.random.split(key, 6)
    x = jax.random.normal(k[0], (N, Cin, D, H, W), dtype=jnp.float32)
    gamma = 1.0 + 0.1 * jax.random.normal(k[1], (Cin,), dtype=jnp.float32)
    beta = 0.1 * jax.random.normal(k[2], (Cin,), dtype=jnp.float32)
    running_mean = 0.1 * jax.random.normal(k[3], (Cin,), dtype=jnp.float32)
    running_var = jnp.abs(1.0 + 0.1 * jax.random.normal(k[4], (Cin,),
                                                        dtype=jnp.float32))
    conv_weight = 0.1 * jax.random.normal(k[5], (Cout, Cin, 1, 1, 1),
                                          dtype=jnp.float32)
    return x, gamma, beta, running_mean, running_var, conv_weight


if __name__ == "__main__":
    key = jax.random.PRNGKey(0)
    k_main, k_tail = jax.random.split(key)

    # Main case: N=2, C_in=4, D=4, H=8, W=8, C_out=8 (S=256, exact tiles).
    args = _make_inputs(k_main, 2, 4, 4, 8, 8, 8)
    out = jax.block_until_ready(bn_ac_conv3d(*args))
    ref = jax.block_until_ready(_reference(*args))
    assert out.shape == (2, 8, 4, 8, 8)
    np.testing.assert_allclose(np.asarray(out), np.asarray(ref),
                               rtol=1e-5, atol=1e-5)

    # Ragged spatial extent (S=105) exercises the masked partial last block
    # (no jnp.pad / slice-back any more).
    args_t = _make_inputs(k_tail, 2, 4, 3, 7, 5, 8)
    out_t = jax.block_until_ready(bn_ac_conv3d(*args_t))
    ref_t = jax.block_until_ready(_reference(*args_t))
    np.testing.assert_allclose(np.asarray(out_t), np.asarray(ref_t),
                               rtol=1e-5, atol=1e-5)

    # bf16 MXU path (f32 affine + f32 accumulation) with a bf16 output stream.
    out_b = jax.block_until_ready(
        bn_ac_conv3d(*args, use_bf16_matmul=True, out_dtype=jnp.bfloat16))
    np.testing.assert_allclose(np.asarray(out_b, dtype=np.float32),
                               np.asarray(ref), rtol=5e-2, atol=5e-2)

    print("KERNEL_OK")
</pallas_src>

<mosaic_0001>
module attributes {stable_mosaic.version = 11 : i64} {
  func.func @_bn_relu_conv_kernel(%arg0: i32, %arg1: i32, %arg2: memref<1x4x256xf32, #tpu.memory_space<vmem>>, %arg3: memref<4x2xf32, #tpu.memory_space<vmem>>, %arg4: memref<8x4xf32, #tpu.memory_space<vmem>>, %arg5: memref<1x8x256xf32, #tpu.memory_space<vmem>>) attributes {dimension_semantics = [#tpu.dimension_semantics<parallel>, #tpu.dimension_semantics<parallel>], iteration_bounds = array<i64: 2, 1>, scalar_prefetch = 0 : i64, scratch_operands = 0 : i64, tpu.core_type = #tpu.core_type<tc>, window_params = [{transform_indices = @transform_0, window_bounds = array<i64: 1, 4, 256>}, {pipeline_mode = #tpu.pipeline_mode<synchronous>, transform_indices = @transform_1, window_bounds = array<i64: 4, 2>}, {pipeline_mode = #tpu.pipeline_mode<synchronous>, transform_indices = @transform_2, window_bounds = array<i64: 8, 4>}, {transform_indices = @transform_3, window_bounds = array<i64: 1, 8, 256>}]} {
    %c0 = arith.constant 0 : index
    %c0_0 = arith.constant 0 : index
    %0 = vector.load %arg3[%c0, %c0_0] : memref<4x2xf32, #tpu.memory_space<vmem>>, vector<4x1xf32>
    %c0_1 = arith.constant 0 : index
    %c1 = arith.constant 1 : index
    %1 = vector.load %arg3[%c0_1, %c1] : memref<4x2xf32, #tpu.memory_space<vmem>>, vector<4x1xf32>
    %c0_2 = arith.constant 0 : index
    %c0_3 = arith.constant 0 : index
    %2 = vector.load %arg4[%c0_2, %c0_3] : memref<8x4xf32, #tpu.memory_space<vmem>>, vector<8x4xf32>
    %c0_4 = arith.constant 0 : index
    %c0_5 = arith.constant 0 : index
    %c0_6 = arith.constant 0 : index
    %3 = vector.load %arg2[%c0_4, %c0_5, %c0_6] : memref<1x4x256xf32, #tpu.memory_space<vmem>>, vector<1x4x256xf32>
    %4 = vector.shape_cast %3 : vector<1x4x256xf32> to vector<4x256xf32>
    %5 = vector.broadcast %0 : vector<4x1xf32> to vector<4x256xf32>
    %6 = arith.mulf %4, %5 : vector<4x256xf32>
    %7 = vector.broadcast %1 : vector<4x1xf32> to vector<4x256xf32>
    %8 = arith.addf %6, %7 : vector<4x256xf32>
    %cst = arith.constant 0.000000e+00 : f32
    %9 = vector.broadcast %cst : f32 to vector<4x256xf32>
    %10 = arith.maximumf %8, %9 : vector<4x256xf32>
    %cst_7 = arith.constant dense<0.000000e+00> : vector<8x256xf32>
    %11 = tpu.matmul %2, %10, %cst_7 {dimension_numbers = #tpu.dot_dimension_numbers<[1], [0], [0], [1], [0, 0, 1, 1], [], []>} : vector<8x4xf32>, vector<4x256xf32>, vector<8x256xf32> -> vector<8x256xf32>
    %c0_8 = arith.constant 0 : index
    %c0_9 = arith.constant 0 : index
    %c0_10 = arith.constant 0 : index
    %12 = vector.load %arg5[%c0_8, %c0_9, %c0_10] : memref<1x8x256xf32, #tpu.memory_space<vmem>>, vector<1x8x256xf32>
    %13 = vector.shape_cast %12 : vector<1x8x256xf32> to vector<8x256xf32>
    %14 = vector.shape_cast %11 : vector<8x256xf32> to vector<1x8x256xf32>
    tpu.vector_store %arg5[%c0_8, %c0_9, %c0_10], %14 {strides = array<i32>} : memref<1x8x256xf32, #tpu.memory_space<vmem>>, vector<1x8x256xf32>,
    return
  }
  func.func @transform_0(%arg0: i32, %arg1: i32) -> (i32, i32, i32) {
    %c0_i32 = arith.constant 0 : i32
    %c0_i32_0 = arith.constant 0 : i32
    return %arg0, %c0_i32, %arg1 : i32, i32, i32
  }
  func.func @transform_1(%arg0: i32, %arg1: i32) -> (i32, i32) {
    %c0_i32 = arith.constant 0 : i32
    %c0_i32_0 = arith.constant 0 : i32
    %c0_i32_1 = arith.constant 0 : i32
    return %c0_i32, %c0_i32_0 : i32, i32
  }
  func.func @transform_2(%arg0: i32, %arg1: i32) -> (i32, i32) {
    %c0_i32 = arith.constant 0 : i32
    %c0_i32_0 = arith.constant 0 : i32
    %c0_i32_1 = arith.constant 0 : i32
    return %c0_i32, %c0_i32_0 : i32, i32
  }
  func.func @transform_3(%arg0: i32, %arg1: i32) -> (i32, i32, i32) {
    %c0_i32 = arith.constant 0 : i32
    %c0_i32_0 = arith.constant 0 : i32
    return %arg0, %c0_i32, %arg1 : i32, i32, i32
  }
}

</mosaic_0001>

<bundles_post_ra>
// kernel: tpu_custom_call.1
= control target key start
LH: loop header
LB: loop body
LE: loop exit
PB: predicated region body
PF: predicated region fallthrough
CT: control target
= control target key end

     0   :  { %8 = vsyncpa [#allocation3], 0  ;;  %s699_s0 = inlined_call_operand.vmem [shape: f32[2,4,256], index: 0, kind: input, shape index: {}]   ;;  %s700_s1 = inlined_call_operand.vmem [shape: f32[4,2], index: 1, kind: input, shape index: {}]   ;;  %s701_s2 = inlined_call_operand.vmem [shape: f32[8,4], index: 2, kind: input, shape index: {}]   ;;  %s702_s3 = inlined_call_operand.hbm [shape: f32[2,8,256], index: 3, kind: output, shape index: {}]  }
   0x1   :  { %10 = vsyncpa [#allocation3 + $0x1], 0  ;;  %s588_s12 = smov 0   ;;  %s590_s13 = smov 0  }
   0x2   :  { %s592_s14 = smov 0   ;;  %s594_s15 = smov 0  }
   0x3   :  { %s596_s16 = smov 0   ;;  %s598_s17 = smov 0  }
   0x4 LB: > { %s406_s18 = sadd.s32 4294967295, %s561_s17   ;;  %s407_s19 = sadd.s32 4294967294, %s561_s17   ;;  %s561_s17 = sphi %s598_s17, %s16_s17   ;;  %s557_s16 = sphi %s596_s16, %s709_s16   ;;  %s553_s15 = sphi %s594_s15, %s708_s15   ;;  %s549_s14 = sphi %s592_s14, %s707_s14   ;;  %s545_s13 = sphi %s590_s13, %s706_s13   ;;  %s541_s12 = sphi %s588_s12, %s705_s12  }
   0x5   : > { %s28_s20 = sadd.s32 1, %s557_s16  ;;  %s107_s21 = sadd.s32 1, %s549_s14 }
   0x6   : > { %p30_p0 = scmp.ge.s32.totalorder %s28_s20, 2  ;;  %p117_p1 = scmp.ne.s32.totalorder %s549_s14, %s545_s13 }
   0x7   : > { %p118_p2 = scmp.eq.s32.totalorder %s406_s18, 1  ;;  %p123_p3 = scmp.ne.s32.totalorder %s545_s13, %s541_s12 }
   0x8   : > { %s711_s20 = smov (%p30_p0, %s28_s20), 0  ;;  %p124_p5 = scmp.eq.s32.totalorder %s407_s19, 1 }
   0x9   : > { %p628_p4 = por %p118_p2, %p117_p1  ;;  %s102_s23 = ssub.s32 %s557_s16, %s711_s20 }
   0xa   : > { %p410_p6 = scmp.ge.s32.totalorder %s561_s17, 1  ;;  %p105_p7 = scmp.eq.s32.totalorder %s102_s23, 0 }
   0xb   : > { %p635_p8 = por %p124_p5, %p123_p3  ;;  %p161_p9 = scmp.lt.s32.totalorder %s561_s17, 3 }
   0xc   : > { %s641_s25 = scalar_select %p105_p7, %s549_s14, %s107_s21  }
   0xd   : > { %p162_p10 = pnand %p410_p6, %p161_p9 }
   0xe   : > { %p190_p11 = scmp.lt.s32.totalorder (!%p162_p10), %s553_s15, 1  ;;  %s186_s8 = sand.u32 (!%p162_p10), 1, %s545_s13  }
   0xf   : > { %165 = sbr.rel (%p162_p10) target bundleno = 369 (0x171), region = 32  ;;  %s411_s9 = sshll.u32 (!%p162_p10), %s186_s8, 4 }
  0x10   : > { %s188_s10 = scalar_lea.vmem (!%p162_p10), [#allocation2], %s411_s9  ;;  %s423_s18 = sshll.u32 (!%p162_p10), %s553_s15, 8 }
  0x11   : > { %s330_s11 = sshll.u32 (!%p162_p10), %s188_s10, 4  ;;  %s328_s23 = scalar_lea.hbm (!%p162_p10), %s702_s3, %s423_s18  ;;  %s656_s11 = int_to_ptr.vmem [resolvable:$true] %s330_s11 }
  0x12   : > { %s314_s26 = scalar_lea.sflag (!%p162_p10), [#allocation3], %s186_s8  ;;  %s485_s27 = scalar_lea.vmem (!%p162_p10), %s656_s11, 256 }
  0x13   : > { %p486_p12 = scmp.ne.s32.totalorder (!%p162_p10), %s656_s11, %s485_s27 }
  0x14   : > { %v200_v0 = vld [vmem:[%s700_s1] sm:$0xf]  ;;  %v563_v1 = vmov 0   ;;  %v564_v2 = vmov 1   ;;  %v565_v3 = vmov 0.0   ;;  %v210_v6 = vlaneseq  ;;  %s191_s28 = scalar_select %p190_p11, %s553_s15, 1 }
  0x15   : > { %483 = vset.pattern.permute.xlu0 %v563_v1  ;;  %304 = vmatprep.mubr.f32.mxu0 %v565_v3  ;;  %v566_v4 = vmov 839922192   ;;  %vm235_vm0 = vcmask 1043456   ;;  %v201_v19 = vld [vmem:[%s701_s2] sm:$0xff]  ;;  %vm231_vm1 = vcmask 31744   ;;  %p487_p13 = pnand %p486_p12, %p628_p4  ;;  %s567_s15 = smov [#allocation2]  }
  0x16   : > { %205 = vperm.xlu0 %483, %v200_v0   ;;  %v208_v5 = vunpack.c.l.s4 %v566_v4  ;;  %v211_v8 = vshrl.u32 %v210_v6, 7  ;;  %s422_s29 = sshll.u32 %s191_s28, 3  ;;  %s489_s28 = sshll.u32 %s567_s15, 4  ;;  %s490_s28 = int_to_ptr.vmem [resolvable:$false] %s489_s28 }
  0x17   : > { %s197_s5 = scalar_lea.vmem %s699_s0, %s422_s29  ;;  %p488_p0 = pneg %p487_p13 }
  0x18   : > { %v209_v7 = vunpack.c.0.s8 %v208_v5  ;;  %v202_v12 = vld [vmem:[%s197_s5] sm:$0xff]  ;;  %s491_s29 = scalar_lea.vmem %s490_s28, 512  ;;  %p492_p1 = scmp.lt.s32.totalorder %s656_s11, %s490_s28 }
  0x19   : > { %p493_p2 = scmp.lt.s32.totalorder %s491_s29, %s485_s27 }
  0x1a   : > { %484 = vset.pattern.permute.xlu0 %v564_v2  ;;  %v212_v9 = vsub.s32 %v209_v7, %v211_v8 }
  0x1b   : > { %217 = vperm.xlu0 %484, %v200_v0   ;;  %p494_p3 = por %p493_p2, %p492_p1 }
  0x1d   : > { %p495_p5 = pnand %p494_p3, %p488_p0 }
  0x91   : > { %v206_v10 = vpop.permute.xlu0 %205 }
  0x92   : > { %v213_v11 = vrot.slane %v206_v10, %v212_v9 }
  0x94   : > { %v215_v14 = vmul.f32 %v213_v11, %v202_v12 }
  0x96   : > { %v218_v13 = vpop.permute.xlu0 %217 }
  0x97   : > { %v225_v15 = vrot.slane %v218_v13, %v212_v9 }
  0x99   : > { %v227_v16 = vadd.f32 %v225_v15, %v215_v14 }
  0x9b   : > { %v228_v17 = vmax.f32 %v227_v16, 0.0 }
  0x9d   : > { %v230_v18 = vcombine.high %v228_v17, %v228_v17 }
  0x9f   : > { %414 = vmatprep.subr.msk.mxu0 %vm235_vm0, %v230_v18 }
  0xa0   : > { %415 = vmatpush1.msk.msra.mxu0 %vm235_vm0, %v228_v17 }
  0xa1   : > { %416 = vmatmul.mubr.msk.f32.vlgmr.msra.gmra.mxu0 %vm231_vm1, %v201_v19 }
 0x161   : > { %v306_v20 = vpop.f32.mrf.mxu0 }
 0x162   : > { %311 = vst [vmem:[%s188_s10] sm:$0xff] %v306_v20 }
 0x163   : > { %v308_v21 = vpop.f32.mrf.mxu0 }
 0x164   : > { %312 = vst [vmem:[%s188_s10 + $0x8] sm:$0xff] %v308_v21 }
 0x165   : > { %498 = shalt.err (!%p495_p5)
}
 0x166   : > { %s499_s30 = scalar_lea.hbm %s328_s23, 256  ;;  %s503_s6 = scalar_lea.hbm %s702_s3, 512 }
 0x167   : > { %p500_p6 = scmp.ne.s32.totalorder %s328_s23, %s499_s30  ;;  %p504_p10 = scmp.lt.s32.totalorder %s328_s23, %s702_s3 }
 0x168   : > { %p505_p11 = scmp.lt.s32.totalorder %s503_s6, %s499_s30 }
 0x169   : > { %p501_p7 = pnand %p500_p6, %p628_p4 }
 0x16a   : > { %p506_p12 = por %p505_p11, %p504_p10 }
 0x16b   : > { %p502_p9 = pneg %p501_p7 }
 0x16d   : > { %p507_p13 = pnand %p506_p12, %p502_p9 }
 0x16f   : > { %510 = shalt.err (!%p507_p13)
}
 0x170   : > { %424 = dma.vmem_to_hbm [thread:$0]  (%p628_p4), %s656_s11, 256, %s328_s23, %s314_s26  }
 0x171 PF: > { %p430_p0 = scmp.ge.s32.totalorder %s561_s17, 2  ;;  %s342_s9 = sand.u32 1, %s541_s12  }
 0x172   : > { %s343_s10 = scalar_lea.sflag [#allocation3], %s342_s9 }
 0x173   : > { %p427_p1 = pnand %p430_p0, %p635_p8 }
 0x175   : > { %p428_p2 = pneg %p427_p1 }
 0x177   : > { %536 = dma.done.wait (%p428_p2), %s343_s10, 256  }
 0x178   : > { %538 = vsyncadd (%p428_p2), %s343_s10, 4294967040  ;;  %s16_s17 = sadd.s32 1, %s561_s17   ;;  %s705_s12 = smov %s545_s13 }
 0x179   : > { %p13_p3 = scmp.ge.s32.totalorder %s16_s17, 4   ;;  %s706_s13 = smov %s549_s14 }
 0x17a   : > { %s707_s14 = smov %s641_s25  ;;  %s708_s15 = smov %s557_s16 }
 0x17b   : > { %s709_s16 = smov %s711_s20  ;;  %15 = sbr.rel (!%p13_p3) target bundleno = 4 (0x4), region = 67 }
 0x180   :  { %348 = vsyncpa [#allocation3], 1 }
 0x181   :  { %350 = vsyncpa [#allocation3 + $0x1], 1 }

</bundles_post_ra>
